<compile_context>
chip_gen: v7x
topology: tpu7x:2x2x1
jax: 0.10.0
libtpu: 0.0.40
codegen_flags: <defaults>
</compile_context>

<pallas_src>
import math

import numpy as np
import jax
import jax.numpy as jnp
from jax import lax
from jax.experimental import pallas as pl
from jax.experimental.pallas import tpu as pltpu


def _tpu_config():
    """Returns (num_core_splits, vmem_limit_bytes, vmem_budget_bytes)."""
    kind = ""
    try:
        kind = jax.devices()[0].device_kind.lower()
    except Exception:
        pass
    is_v7 = ("7x" in kind) or ("v7" in kind)
    two_core = is_v7 or ("v4" in kind) or ("v5p" in kind)

    # Conservative defaults by generation; refine with get_tpu_info if present.
    if is_v7:
        vmem_cap = 64 << 20
    elif ("v2" in kind) or ("v3" in kind):
        vmem_cap = 16 << 20
    else:                       # v4 / v5e / v5p / v6e: 128 MiB per core
        vmem_cap = 128 << 20
    try:
        vmem_cap = int(pltpu.get_tpu_info().vmem_capacity_bytes)
    except Exception:
        pass

    if vmem_cap >= (96 << 20):          # 128 MiB parts (v4/v5e/v5p/v6e)
        limit = 96 << 20
    elif vmem_cap >= (48 << 20):        # 64 MiB per-TensorCore parts (v7x)
        limit = 48 << 20
    else:                               # very old parts: stay well inside
        limit = max(vmem_cap - (4 << 20), 8 << 20)
    if is_v7:
        limit = min(limit, 48 << 20)    # never assume >48 MiB usable on v7x

    budget = max(limit - (16 << 20), limit // 2)   # compiler/DMA headroom
    nc = 2 if two_core else 1
    return nc, limit, budget


def _choose_tn(N, H, W, nc, vmem_budget, in_itemsize):
    """Images per grid step, sized against an explicit per-buffer VMEM budget."""
    per_img = H * W
    per_img_bytes = (
        2 * 2 * in_itemsize      # two input operands, double-buffered
        + 2                      # d slab        (bf16, W lanes)
        + 4 + 4                  # p / pr slabs  (bf16, 2W lanes each)
        + 16                     # transient f32 stage-A result + shuffle temp
    ) * per_img
    fixed = (
        2 * (2 * 2 * W * W)      # [Cw|Sw] constant, bf16, 2 pipeline buffers
        + 2 * 2 * (2 * H * H)    # Ch, Sh constants, bf16, 2 buffers each
        + 8 * H * W              # (H, 2W) f32 accumulator
        + (2 << 20)              # slack
    )
    avail = max(vmem_budget - fixed, per_img_bytes)
    tn = max(1, avail // per_img_bytes)
    tn = min(tn, max(1, -(-N // nc)))    # never more than real work per core
    tn = min(tn, 512)
    req = 8 // math.gcd(H, 8)            # keep (tn*H) % 8 == 0 (sublane tiles)
    tn = max(req, (tn // req) * req)
    return int(tn)


def _dft_consts(H, W, dtype):
    # cos/sin(2*pi*u*k/n) computed in float64 with the argument reduced mod n
    # (exact for realistic n), cast once to the MXU dtype.
    def _cs(n):
        k = np.arange(n, dtype=np.int64)
        ang = (2.0 * np.pi / n) * ((k[:, None] * k[None, :]) % n)
        return np.cos(ang), np.sin(ang)

    ch, sh = _cs(H)
    cw, sw = _cs(W)
    csw = np.concatenate([cw, sw], axis=1)               # (W, 2W) = [Cw | Sw]
    return (jnp.asarray(csw, dtype),
            jnp.asarray(ch, dtype),
            jnp.asarray(sh, dtype))


def _fft_l1_kernel(x1_ref, x2_ref, csw_ref, ch_ref, sh_ref, out_ref,
                   d_ref, p_ref, pr_ref, acc_ref):
    g = pl.program_id(1)

    @pl.when(g == 0)
    def _():
        acc_ref[...] = jnp.zeros_like(acc_ref)

    W = csw_ref.shape[0]
    H = ch_ref.shape[0]
    tn = d_ref.shape[0] // H                      # images in this block

    # Difference of TN sublane-stacked images, one vector op, cast to bf16.
    d_ref[...] = (x1_ref[...].astype(jnp.float32)
                  - x2_ref[...].astype(jnp.float32)).astype(jnp.bfloat16)

    # Stage A: one lane-dense MXU matmul for all TN images.
    #   p = [ d @ Cw | d @ Sw ]                   (tn*H, 2W) f32
    p = jnp.dot(d_ref[...], csw_ref[...], preferred_element_type=jnp.float32)
    p_ref[...] = p.astype(jnp.bfloat16)
    # Swapped + sign-flipped companion:  pr = [ -d @ Sw | d @ Cw ]
    pr_ref[...] = jnp.concatenate([-p[:, W:], p[:, :W]],
                                  axis=1).astype(jnp.bfloat16)

    # Stage B: per image t,
    #   Ch @ p_t + Sh @ pr_t = [ Ch d Cw - Sh d Sw | Ch d Sw + Sh d Cw ]
    #                        = [ Re(Y_t) | -Im(Y_t) ]
    # so a single |.| of the (H, 2W) result accumulates |Re| + |Im|.
    def body(t, carry):
        r0 = pl.multiple_of(t * H, H)
        pt = p_ref[pl.ds(r0, H), :]
        prt = pr_ref[pl.ds(r0, H), :]
        res = (jnp.dot(ch_ref[...], pt, preferred_element_type=jnp.float32)
               + jnp.dot(sh_ref[...], prt, preferred_element_type=jnp.float32))
        acc_ref[...] += jnp.abs(res)
        return carry

    lax.fori_loop(0, tn, body, 0)

    # Single cross-lane/sublane reduction + store, once per core, in epilogue.
    @pl.when(g == pl.num_programs(1) - 1)
    def _():
        total = jnp.sum(acc_ref[...])
        out_ref[...] = jnp.full(out_ref.shape, total, dtype=out_ref.dtype)


def fft_l1_loss(img1, img2):
    """Pallas TPU forward pass of the PyTorch `FFT` module (scalar f32 loss)."""
    assert img1.shape == img2.shape
    B, C, H, W = img1.shape
    N = B * C

    # Honour bf16 inputs (halves input DMA); otherwise keep f32 on the wire.
    in_dtype = (jnp.bfloat16
                if (img1.dtype == jnp.bfloat16 and img2.dtype == jnp.bfloat16)
                else jnp.float32)
    x1 = jnp.asarray(img1, in_dtype).reshape(N * H, W)
    x2 = jnp.asarray(img2, in_dtype).reshape(N * H, W)

    nc, vmem_limit, vmem_budget = _tpu_config()
    tn = _choose_tn(N, H, W, nc, vmem_budget, jnp.dtype(in_dtype).itemsize)

    g_total = -(-N // tn)                    # TN-image groups covering N
    g_per = max(1, -(-g_total // nc))        # groups per parallel core slice
    n_pad = nc * g_per * tn
    if n_pad != N:
        # Pad BOTH inputs identically with zeros: padded images have d = 0 and
        # contribute exactly 0 to the |FFT| sums (denominator uses the real N).
        pad_rows = (n_pad - N) * H
        x1 = jnp.pad(x1, ((0, pad_rows), (0, 0)))
        x2 = jnp.pad(x2, ((0, pad_rows), (0, 0)))

    csw, ch, sh = _dft_consts(H, W, jnp.bfloat16)

    img_spec = pl.BlockSpec((tn * H, W),
                            lambda c, g, gp=g_per: (c * gp + g, 0))
    const_specs = [pl.BlockSpec(m.shape, lambda c, g: (0, 0))
                   for m in (csw, ch, sh)]     # constant index -> fetched once

    out = pl.pallas_call(
        _fft_l1_kernel,
        out_shape=jax.ShapeDtypeStruct((nc, 8, 128), jnp.float32),
        grid_spec=pltpu.PrefetchScalarGridSpec(
            num_scalar_prefetch=0,
            grid=(nc, g_per),
            in_specs=[img_spec, img_spec, *const_specs],
            out_specs=pl.BlockSpec((1, 8, 128), lambda c, g: (c, 0, 0)),
            scratch_shapes=[
                pltpu.VMEM((tn * H, W), jnp.bfloat16),       # d slab
                pltpu.VMEM((tn * H, 2 * W), jnp.bfloat16),   # [ d Cw |  d Sw ]
                pltpu.VMEM((tn * H, 2 * W), jnp.bfloat16),   # [-d Sw |  d Cw ]
                pltpu.VMEM((H, 2 * W), jnp.float32),         # |Re|+|Im| accum
            ],
        ),
        compiler_params=pltpu.CompilerParams(
            dimension_semantics=("parallel", "arbitrary"),
            vmem_limit_bytes=vmem_limit,
        ),
    )(x1, x2, csw, ch, sh)

    inv_denom = 1.0 / float(2 * B * C * H * W)
    return jnp.sum(out[:, 0, 0]) * inv_denom


def _reference_loss(img1, img2):
    f1 = jnp.fft.fft2(jnp.asarray(img1, jnp.float32), axes=(-2, -1))
    f2 = jnp.fft.fft2(jnp.asarray(img2, jnp.float32), axes=(-2, -1))
    d = f1 - f2
    # L1Loss(mean) over the real/imag-stacked representation (2*B*C*H*W elems).
    return (jnp.sum(jnp.abs(d.real)) + jnp.sum(jnp.abs(d.imag))) / (2.0 * d.size)


if __name__ == "__main__":
    key = jax.random.PRNGKey(0)
    k1, k2 = jax.random.split(key)
    B, C, H, W = 2, 4, 16, 16
    img1 = jax.random.normal(k1, (B, C, H, W), dtype=jnp.float32)
    img2 = jax.random.normal(k2, (B, C, H, W), dtype=jnp.float32)

    loss = jax.jit(fft_l1_loss)(img1, img2)
    jax.block_until_ready(loss)

    ref = _reference_loss(img1, img2)
    np.testing.assert_allclose(np.asarray(loss), np.asarray(ref),
                               rtol=1e-2, atol=1e-3)

    print("KERNEL_OK")
</pallas_src>

<mosaic_0001>
module attributes {stable_mosaic.version = 11 : i64} {
  func.func @_fft_l1_kernel(%arg0: i32, %arg1: i32, %arg2: memref<128x16xf32, #tpu.memory_space<vmem>>, %arg3: memref<128x16xf32, #tpu.memory_space<vmem>>, %arg4: memref<16x32xbf16, #tpu.memory_space<vmem>>, %arg5: memref<16x16xbf16, #tpu.memory_space<vmem>>, %arg6: memref<16x16xbf16, #tpu.memory_space<vmem>>, %arg7: memref<1x8x128xf32, #tpu.memory_space<vmem>>, %arg8: memref<128x16xbf16, #tpu.memory_space<vmem>>, %arg9: memref<128x32xbf16, #tpu.memory_space<vmem>>, %arg10: memref<128x32xbf16, #tpu.memory_space<vmem>>, %arg11: memref<16x32xf32, #tpu.memory_space<vmem>>) attributes {dimension_semantics = [#tpu.dimension_semantics<parallel>, #tpu.dimension_semantics<arbitrary>], iteration_bounds = array<i64: 1, 1>, scalar_prefetch = 0 : i64, scratch_operands = 4 : i64, tpu.core_type = #tpu.core_type<tc>, window_params = [{transform_indices = @transform_0, window_bounds = array<i64: 128, 16>}, {transform_indices = @transform_1, window_bounds = array<i64: 128, 16>}, {pipeline_mode = #tpu.pipeline_mode<synchronous>, transform_indices = @transform_2, window_bounds = array<i64: 16, 32>}, {pipeline_mode = #tpu.pipeline_mode<synchronous>, transform_indices = @transform_3, window_bounds = array<i64: 16, 16>}, {pipeline_mode = #tpu.pipeline_mode<synchronous>, transform_indices = @transform_4, window_bounds = array<i64: 16, 16>}, {transform_indices = @transform_5, window_bounds = array<i64: 1, 8, 128>}]} {
    %c0_i32 = arith.constant 0 : i32
    %0 = arith.cmpi eq, %arg1, %c0_i32 : i32
    %1 = arith.extui %0 : i1 to i32
    %c0_i32_0 = arith.constant 0 : i32
    %2 = arith.cmpi ne, %1, %c0_i32_0 : i32
    scf.if %2 {
      %cst_19 = arith.constant 0.000000e+00 : f32
      %24 = vector.broadcast %cst_19 : f32 to vector<16x32xf32>
      %c0_20 = arith.constant 0 : index
      %c0_21 = arith.constant 0 : index
      %25 = vector.load %arg11[%c0_20, %c0_21] : memref<16x32xf32, #tpu.memory_space<vmem>>, vector<16x32xf32>
      tpu.vector_store %arg11[%c0_20, %c0_21], %24 {strides = array<i32>} : memref<16x32xf32, #tpu.memory_space<vmem>>, vector<16x32xf32>,
    } else {
    }
    %c0 = arith.constant 0 : index
    %c0_1 = arith.constant 0 : index
    %3 = vector.load %arg2[%c0, %c0_1] : memref<128x16xf32, #tpu.memory_space<vmem>>, vector<128x16xf32>
    %c0_2 = arith.constant 0 : index
    %c0_3 = arith.constant 0 : index
    %4 = vector.load %arg3[%c0_2, %c0_3] : memref<128x16xf32, #tpu.memory_space<vmem>>, vector<128x16xf32>
    %5 = arith.subf %3, %4 : vector<128x16xf32>
    %6 = arith.truncf %5 : vector<128x16xf32> to vector<128x16xbf16>
    %c0_4 = arith.constant 0 : index
    %c0_5 = arith.constant 0 : index
    %7 = vector.load %arg8[%c0_4, %c0_5] : memref<128x16xbf16, #tpu.memory_space<vmem>>, vector<128x16xbf16>
    tpu.vector_store %arg8[%c0_4, %c0_5], %6 {strides = array<i32>} : memref<128x16xbf16, #tpu.memory_space<vmem>>, vector<128x16xbf16>,
    %c0_6 = arith.constant 0 : index
    %c0_7 = arith.constant 0 : index
    %8 = vector.load %arg8[%c0_6, %c0_7] : memref<128x16xbf16, #tpu.memory_space<vmem>>, vector<128x16xbf16>
    %c0_8 = arith.constant 0 : index
    %c0_9 = arith.constant 0 : index
    %9 = vector.load %arg4[%c0_8, %c0_9] : memref<16x32xbf16, #tpu.memory_space<vmem>>, vector<16x32xbf16>
    %cst = arith.constant dense<0.000000e+00> : vector<128x32xf32>
    %10 = tpu.matmul %8, %9, %cst {dimension_numbers = #tpu.dot_dimension_numbers<[1], [0], [0], [1], [0, 0, 1, 1], [], []>} : vector<128x16xbf16>, vector<16x32xbf16>, vector<128x32xf32> -> vector<128x32xf32>
    %11 = arith.truncf %10 : vector<128x32xf32> to vector<128x32xbf16>
    %c0_10 = arith.constant 0 : index
    %c0_11 = arith.constant 0 : index
    %12 = vector.load %arg9[%c0_10, %c0_11] : memref<128x32xbf16, #tpu.memory_space<vmem>>, vector<128x32xbf16>
    tpu.vector_store %arg9[%c0_10, %c0_11], %11 {strides = array<i32>} : memref<128x32xbf16, #tpu.memory_space<vmem>>, vector<128x32xbf16>,
    %13 = vector.extract_strided_slice %10 {offsets = [0, 16], sizes = [128, 16], strides = [1, 1]} : vector<128x32xf32> to vector<128x16xf32>
    %cst_12 = arith.constant 0.000000e+00 : f32
    %14 = vector.broadcast %cst_12 : f32 to vector<128x16xf32>
    %15 = arith.subf %14, %13 : vector<128x16xf32>
    %16 = vector.extract_strided_slice %10 {offsets = [0, 0], sizes = [128, 16], strides = [1, 1]} : vector<128x32xf32> to vector<128x16xf32>
    %17 = tpu.concatenate %15, %16 in 1 : vector<128x16xf32>, vector<128x16xf32> -> vector<128x32xf32>
    %18 = arith.truncf %17 : vector<128x32xf32> to vector<128x32xbf16>
    %c0_13 = arith.constant 0 : index
    %c0_14 = arith.constant 0 : index
    %19 = vector.load %arg10[%c0_13, %c0_14] : memref<128x32xbf16, #tpu.memory_space<vmem>>, vector<128x32xbf16>
    tpu.vector_store %arg10[%c0_13, %c0_14], %18 {strides = array<i32>} : memref<128x32xbf16, #tpu.memory_space<vmem>>, vector<128x32xbf16>,
    %c0_i32_15 = arith.constant 0 : i32
    %c8_i32 = arith.constant 8 : i32
    %20 = arith.addi %c0_i32_15, %c8_i32 : i32
    %c1_i32 = arith.constant 1 : i32
    scf.for %arg12 = %c0_i32_15 to %20 step %c1_i32  : i32 {
      %c16_i32 = arith.constant 16 : i32
      %24 = arith.muli %arg12, %c16_i32 : i32
      %25 = tpu.assume_multiple %24, 16 : i32
      %26 = arith.index_cast %25 : i32 to index
      %c0_19 = arith.constant 0 : index
      %27 = vector.load %arg9[%26, %c0_19] : memref<128x32xbf16, #tpu.memory_space<vmem>>, vector<16x32xbf16>
      %28 = arith.index_cast %25 : i32 to index
      %c0_20 = arith.constant 0 : index
      %29 = vector.load %arg10[%28, %c0_20] : memref<128x32xbf16, #tpu.memory_space<vmem>>, vector<16x32xbf16>
      %c0_21 = arith.constant 0 : index
      %c0_22 = arith.constant 0 : index
      %30 = vector.load %arg5[%c0_21, %c0_22] : memref<16x16xbf16, #tpu.memory_space<vmem>>, vector<16x16xbf16>
      %cst_23 = arith.constant dense<0.000000e+00> : vector<16x32xf32>
      %31 = tpu.matmul %30, %27, %cst_23 {dimension_numbers = #tpu.dot_dimension_numbers<[1], [0], [0], [1], [0, 0, 1, 1], [], []>} : vector<16x16xbf16>, vector<16x32xbf16>, vector<16x32xf32> -> vector<16x32xf32>
      %c0_24 = arith.constant 0 : index
      %c0_25 = arith.constant 0 : index
      %32 = vector.load %arg6[%c0_24, %c0_25] : memref<16x16xbf16, #tpu.memory_space<vmem>>, vector<16x16xbf16>
      %cst_26 = arith.constant dense<0.000000e+00> : vector<16x32xf32>
      %33 = tpu.matmul %32, %29, %cst_26 {dimension_numbers = #tpu.dot_dimension_numbers<[1], [0], [0], [1], [0, 0, 1, 1], [], []>} : vector<16x16xbf16>, vector<16x32xbf16>, vector<16x32xf32> -> vector<16x32xf32>
      %34 = arith.addf %31, %33 : vector<16x32xf32>
      %c0_27 = arith.constant 0 : index
      %c0_28 = arith.constant 0 : index
      %35 = vector.load %arg11[%c0_27, %c0_28] : memref<16x32xf32, #tpu.memory_space<vmem>>, vector<16x32xf32>
      %36 = math.absf %34 : vector<16x32xf32>
      %37 = arith.addf %35, %36 : vector<16x32xf32>
      %c0_29 = arith.constant 0 : index
      %c0_30 = arith.constant 0 : index
      %38 = vector.load %arg11[%c0_29, %c0_30] : memref<16x32xf32, #tpu.memory_space<vmem>>, vector<16x32xf32>
      tpu.vector_store %arg11[%c0_29, %c0_30], %37 {strides = array<i32>} : memref<16x32xf32, #tpu.memory_space<vmem>>, vector<16x32xf32>,
    }
    %c8_i32_16 = arith.constant 8 : i32
    %c0_i32_17 = arith.constant 0 : i32
    %21 = arith.cmpi eq, %arg1, %c0_i32_17 : i32
    %22 = arith.extui %21 : i1 to i32
    %c0_i32_18 = arith.constant 0 : i32
    %23 = arith.cmpi ne, %22, %c0_i32_18 : i32
    scf.if %23 {
      %c0_19 = arith.constant 0 : index
      %c0_20 = arith.constant 0 : index
      %24 = vector.load %arg11[%c0_19, %c0_20] : memref<16x32xf32, #tpu.memory_space<vmem>>, vector<16x32xf32>
      %25 = vector.shape_cast %24 : vector<16x32xf32> to vector<1x16x32xf32>
      %cst_21 = arith.constant dense<0.000000e+00> : vector<1xf32>
      %26 = vector.multi_reduction <add>, %25, %cst_21 [1, 2] : vector<1x16x32xf32> to vector<1xf32>
      %27 = vector.shape_cast %26 : vector<1xf32> to vector<1x1x1xf32>
      %28 = vector.extract %27[0, 0, 0] : f32 from vector<1x1x1xf32>
      %29 = vector.broadcast %28 : f32 to vector<1x8x128xf32>
      %c0_22 = arith.constant 0 : index
      %c0_23 = arith.constant 0 : index
      %c0_24 = arith.constant 0 : index
      %30 = vector.load %arg7[%c0_22, %c0_23, %c0_24] : memref<1x8x128xf32, #tpu.memory_space<vmem>>, vector<1x8x128xf32>
      tpu.vector_store %arg7[%c0_22, %c0_23, %c0_24], %29 {strides = array<i32>} : memref<1x8x128xf32, #tpu.memory_space<vmem>>, vector<1x8x128xf32>,
    } else {
    }
    return
  }
  func.func @transform_0(%arg0: i32, %arg1: i32) -> (i32, i32) {
    %c1_i32 = arith.constant 1 : i32
    %0 = arith.muli %arg0, %c1_i32 : i32
    %1 = arith.addi %0, %arg1 : i32
    %c0_i32 = arith.constant 0 : i32
    %c0_i32_0 = arith.constant 0 : i32
    return %1, %c0_i32 : i32, i32
  }
  func.func @transform_1(%arg0: i32, %arg1: i32) -> (i32, i32) {
    %c1_i32 = arith.constant 1 : i32
    %0 = arith.muli %arg0, %c1_i32 : i32
    %1 = arith.addi %0, %arg1 : i32
    %c0_i32 = arith.constant 0 : i32
    %c0_i32_0 = arith.constant 0 : i32
    return %1, %c0_i32 : i32, i32
  }
  func.func @transform_2(%arg0: i32, %arg1: i32) -> (i32, i32) {
    %c0_i32 = arith.constant 0 : i32
    %c0_i32_0 = arith.constant 0 : i32
    %c0_i32_1 = arith.constant 0 : i32
    return %c0_i32, %c0_i32_0 : i32, i32
  }
  func.func @transform_3(%arg0: i32, %arg1: i32) -> (i32, i32) {
    %c0_i32 = arith.constant 0 : i32
    %c0_i32_0 = arith.constant 0 : i32
    %c0_i32_1 = arith.constant 0 : i32
    return %c0_i32, %c0_i32_0 : i32, i32
  }
  func.func @transform_4(%arg0: i32, %arg1: i32) -> (i32, i32) {
    %c0_i32 = arith.constant 0 : i32
    %c0_i32_0 = arith.constant 0 : i32
    %c0_i32_1 = arith.constant 0 : i32
    return %c0_i32, %c0_i32_0 : i32, i32
  }
  func.func @transform_5(%arg0: i32, %arg1: i32) -> (i32, i32, i32) {
    %c0_i32 = arith.constant 0 : i32
    %c0_i32_0 = arith.constant 0 : i32
    %c0_i32_1 = arith.constant 0 : i32
    return %arg0, %c0_i32, %c0_i32_0 : i32, i32, i32
  }
}

</mosaic_0001>

<bundles_post_ra>
// kernel: fft_l1_loss.1
= control target key start
LH: loop header
LB: loop body
LE: loop exit
PB: predicated region body
PF: predicated region fallthrough
CT: control target
= control target key end

     0   :  { %10 = vsyncpa [#allocation7], 0  ;;  %s1198_s0 = inlined_call_operand.hbm [shape: f32[128,16], index: 0, kind: input, shape index: {}]   ;;  %s1199_s1 = inlined_call_operand.hbm [shape: f32[128,16], index: 1, kind: input, shape index: {}]   ;;  %s1200_s2 = inlined_call_operand.hbm [shape: bf16[16,32], index: 2, kind: input, shape index: {}]   ;;  %s1201_s3 = inlined_call_operand.hbm [shape: bf16[16,16], index: 3, kind: input, shape index: {}]   ;;  %s1202_s4 = inlined_call_operand.hbm [shape: bf16[16,16], index: 4, kind: input, shape index: {}]   ;;  %s1203_s5 = inlined_call_operand.hbm [shape: f32[1,8,128], index: 5, kind: output, shape index: {}]  }
   0x1   :  { %11 = vsyncpa [#allocation10], 0 }
   0x2   :  { %12 = vsyncpa [#allocation13], 0 }
   0x3   :  { %13 = vsyncpa [#allocation8], 0  ;;  %s993_s18 = smov [#allocation9]   ;;  %s845_s22 = scalar_lea.hbm %s1199_s1, 2048 }
   0x4   :  { %s39_s19 = sshll.u32 %s993_s18, 4  ;;  %p846_p0 = scmp.ne.s32.totalorder %s1199_s1, %s845_s22  ;;  %s40_s19 = int_to_ptr.vmem [resolvable:$true] %s39_s19 }
   0x5   :  { %p849_p1 = scmp.lt.u32.totalorder %s845_s22, %s1199_s1 }
   0x7   :  { %p851_p2 = pnand %p849_p1, %p846_p0 }
   0x9   :  { %854 = shalt.err (!%p851_p2)
}
   0xa   :  { %s855_s27 = scalar_lea.vmem %s40_s19, 2048  ;;  %p860_p4 = scmp.lt.s32.totalorder %s40_s19, %s40_s19 }
   0xb   :  { %p856_p3 = scmp.ne.s32.totalorder %s40_s19, %s855_s27  ;;  %p861_p5 = scmp.lt.s32.totalorder %s855_s27, %s855_s27 }
   0xd   :  { %p862_p6 = por %p861_p5, %p860_p4 }
   0xf   :  { %p863_p7 = pnand %p862_p6, %p856_p3 }
  0x11   :  { %866 = shalt.err (!%p863_p7)
}
  0x12   :  { %s994_s28 = smov 128   ;;  %s995_s29 = smov 8  }
  0x13   :  { %45 = dma.hbm_to_vmem [thread:$0]  %s1199_s1, 2048, %s40_s19, [#allocation10], %s994_s28, %s994_s28, %s995_s29  }
  0x14   :  { %s996_s7 = smov [#allocation12]   ;;  %s997_s9 = smov [#allocation6]  }
  0x15   :  { %s63_s8 = sshll.u32 %s996_s7, 4  ;;  %s23_s10 = sshll.u32 %s997_s9, 4  ;;  %s64_s8 = int_to_ptr.vmem [resolvable:$true] %s63_s8  ;;  %s24_s10 = int_to_ptr.vmem [resolvable:$true] %s23_s10 }
  0x16   :  { %s867_s13 = scalar_lea.hbm %s1201_s3, 128 }
  0x17   :  { %p868_p8 = scmp.ne.s32.totalorder %s1201_s3, %s867_s13  ;;  %p871_p9 = scmp.lt.u32.totalorder %s867_s13, %s1201_s3 }
  0x19   :  { %p873_p10 = pnand %p871_p9, %p868_p8 }
  0x1b   :  { %876 = shalt.err (!%p873_p10)
}
  0x1c   :  { %s877_s1 = scalar_lea.vmem %s64_s8, 128  ;;  %p882_p12 = scmp.lt.s32.totalorder %s64_s8, %s64_s8 }
  0x1d   :  { %p878_p11 = scmp.ne.s32.totalorder %s64_s8, %s877_s1  ;;  %p883_p13 = scmp.lt.s32.totalorder %s877_s1, %s877_s1 }
  0x1f   :  { %p884_p0 = por %p883_p13, %p882_p12 }
  0x21   :  { %p885_p1 = pnand %p884_p0, %p878_p11 }
  0x23   :  { %888 = shalt.err (!%p885_p1)
}
  0x24   :  { %s998_s18 = smov 64   ;;  %s999_s19 = smov 4  }
  0x25   :  { %69 = dma.hbm_to_vmem [thread:$0]  %s1201_s3, 128, %s64_s8, [#allocation13], %s998_s18, %s998_s18, %s999_s19  }
  0x26   :  { %s889_s24 = scalar_lea.hbm %s1198_s0, 2048 }
  0x27   :  { %p890_p2 = scmp.ne.s32.totalorder %s1198_s0, %s889_s24  ;;  %p893_p3 = scmp.lt.u32.totalorder %s889_s24, %s1198_s0 }
  0x29   :  { %p895_p4 = pnand %p893_p3, %p890_p2 }
  0x2b   :  { %898 = shalt.err (!%p895_p4)
}
  0x2c   :  { %s899_s6 = scalar_lea.vmem %s24_s10, 2048  ;;  %p904_p6 = scmp.lt.s32.totalorder %s24_s10, %s24_s10 }
  0x2d   :  { %p900_p5 = scmp.ne.s32.totalorder %s24_s10, %s899_s6  ;;  %p905_p7 = scmp.lt.s32.totalorder %s899_s6, %s899_s6 }
  0x2f   :  { %p906_p8 = por %p905_p7, %p904_p6 }
  0x31   :  { %p907_p9 = pnand %p906_p8, %p900_p5 }
  0x33   :  { %910 = shalt.err (!%p907_p9)
}
  0x34   :  { %29 = dma.hbm_to_vmem [thread:$0]  %s1198_s0, 2048, %s24_s10, [#allocation7], %s994_s28, %s994_s28, %s995_s29  }
  0x35   :  { %s1000_s8 = smov [#allocation11]   ;;  %s1001_s11 = smov [#allocation14]  }
  0x36   :  { %s51_s9 = sshll.u32 %s1000_s8, 4  ;;  %s75_s12 = sshll.u32 %s1001_s11, 4  ;;  %s52_s9 = int_to_ptr.vmem [resolvable:$true] %s51_s9  ;;  %s76_s12 = int_to_ptr.vmem [resolvable:$true] %s75_s12 }
  0x37   :  { %s911_s15 = scalar_lea.hbm %s1200_s2, 128 }
  0x38   :  { %p912_p10 = scmp.ne.s32.totalorder %s1200_s2, %s911_s15  ;;  %p915_p11 = scmp.lt.u32.totalorder %s911_s15, %s1200_s2 }
  0x3a   :  { %p917_p12 = pnand %p915_p11, %p912_p10 }
  0x3c   :  { %920 = shalt.err (!%p917_p12)
}
  0x3d   :  { %s921_s0 = scalar_lea.vmem %s52_s9, 128  ;;  %p926_p0 = scmp.lt.s32.totalorder %s52_s9, %s52_s9 }
  0x3e   :  { %p922_p13 = scmp.ne.s32.totalorder %s52_s9, %s921_s0  ;;  %p927_p1 = scmp.lt.s32.totalorder %s921_s0, %s921_s0 }
  0x40   :  { %p928_p2 = por %p927_p1, %p926_p0 }
  0x42   :  { %p929_p3 = pnand %p928_p2, %p922_p13 }
  0x44   :  { %932 = shalt.err (!%p929_p3)
}
  0x45   :  { %57 = dma.hbm_to_vmem [thread:$0]  %s1200_s2, 128, %s52_s9, [#allocation10], %s998_s18, %s998_s18, %s999_s19  }
  0x46   :  { %s933_s22 = scalar_lea.hbm %s1202_s4, 128 }
  0x47   :  { %p934_p4 = scmp.ne.s32.totalorder %s1202_s4, %s933_s22  ;;  %p937_p5 = scmp.lt.u32.totalorder %s933_s22, %s1202_s4 }
  0x49   :  { %p939_p6 = pnand %p937_p5, %p934_p4 }
  0x4b   :  { %942 = shalt.err (!%p939_p6)
}
  0x4c   :  { %s943_s27 = scalar_lea.vmem %s76_s12, 128  ;;  %p948_p8 = scmp.lt.s32.totalorder %s76_s12, %s76_s12 }
  0x4d   :  { %p944_p7 = scmp.ne.s32.totalorder %s76_s12, %s943_s27  ;;  %p949_p9 = scmp.lt.s32.totalorder %s943_s27, %s943_s27 }
  0x4f   :  { %p950_p10 = por %p949_p9, %p948_p8 }
  0x51   :  { %p951_p11 = pnand %p950_p10, %p944_p7 }
  0x53   :  { %954 = shalt.err (!%p951_p11)
}
  0x54   :  { %81 = dma.hbm_to_vmem [thread:$0]  %s1202_s4, 128, %s76_s12, [#allocation13], %s998_s18, %s998_s18, %s999_s19  }
  0x55   :  { %981 = dma.done.wait [#allocation7], 2048  }
  0x56   :  { %982 = vsyncadd [#allocation7], 4294965248 }
  0x57   :  { %983 = dma.done.wait [#allocation10], 2176  }
  0x58   :  { %984 = vsyncadd [#allocation10], 4294965120 }
  0x59   :  { %985 = dma.done.wait [#allocation13], 256  }
  0x5a   :  { %986 = vsyncadd [#allocation13], 4294967040  ;;  %v842_v0 = vld [vmem:[#allocation11] sm:$0xff]   ;;  %v110_v2 = vld [vmem:[#allocation6 + $0x8] sm:$0xff]  ;;  %vm165_vm0 = vcmask 130048   ;;  %vm106_vm1 = vcmask 261120  }
  0x5b   :  { %v109_v1 = vld [vmem:[#allocation6] sm:$0xff]  ;;  %703 = vmatprep.subr.bf16.mxu0 %v842_v0  ;;  %733 = vmatprep.subr.bf16.mxu1 %v842_v0  ;;  %v126_v4 = vld [vmem:[#allocation9 + $0x8] sm:$0xff]  ;;  %v111_v6 = vld [vmem:[#allocation6 + $0x10] sm:$0xff]  ;;  %s1003_s4 = smov 16   ;;  %s1004_s18 = smov 112  }
  0x5c   :  { %v125_v3 = vld [vmem:[#allocation9] sm:$0xff]  ;;  %v112_v7 = vld [vmem:[#allocation6 + $0x18] sm:$0xff]  ;;  %704 = vmatpush3.bf16.msra.mxu0 %v842_v0  ;;  %734 = vmatpush3.bf16.msra.mxu1 %v842_v0  ;;  %v142_v8 = vsub.f32 %v110_v2, %v126_v4  ;;  %v127_v9 = vld [vmem:[#allocation9 + $0x10] sm:$0xff]  ;;  %s1171_s19 = smov 0  }
  0x5d   :  { %v141_v5 = vsub.f32 %v109_v1, %v125_v3  ;;  %v128_v10 = vld [vmem:[#allocation9 + $0x18] sm:$0xff]  ;;  %v117_v11 = vld [vmem:[#allocation6 + $0x40] sm:$0xff]  ;;  %v143_v12 = vsub.f32 %v111_v6, %v127_v9  ;;  %v118_v14 = vld [vmem:[#allocation6 + $0x48] sm:$0xff]  ;;  %v1002_v1 = vmov 0.0  }
  0x5e   :  { %v144_v13 = vsub.f32 %v112_v7, %v128_v10  ;;  %v133_v15 = vld [vmem:[#allocation9 + $0x40] sm:$0xff]  ;;  %v134_v16 = vld [vmem:[#allocation9 + $0x48] sm:$0xff]  ;;  %v119_v20 = vld [vmem:[#allocation6 + $0x50] sm:$0xff]  ;;  %107 = vst.msk [vmem:[#allocation5] sm:$0xff] %vm106_vm1, %v1002_v1 }
  0x5f   :  { %v157_v17 = vpack.c.bf16 %v142_v8, %v141_v5  ;;  %v149_v18 = vsub.f32 %v117_v11, %v133_v15  ;;  %v150_v19 = vsub.f32 %v118_v14, %v134_v16  ;;  %v120_v21 = vld [vmem:[#allocation6 + $0x58] sm:$0xff]  ;;  %v135_v22 = vld [vmem:[#allocation9 + $0x50] sm:$0xff]  ;;  %v113_v26 = vld [vmem:[#allocation6 + $0x20] sm:$0xff]  ;;  %108 = vst.msk [vmem:[#allocation5 + $0x8] sm:$0xff] %vm106_vm1, %v1002_v1 }
  0x60   :  { %v158_v23 = vpack.c.bf16 %v144_v13, %v143_v12  ;;  %v136_v24 = vld [vmem:[#allocation9 + $0x58] sm:$0xff]  ;;  %v151_v25 = vsub.f32 %v119_v20, %v135_v22  ;;  %v114_v27 = vld [vmem:[#allocation6 + $0x28] sm:$0xff]  ;;  %v129_v30 = vld [vmem:[#allocation9 + $0x20] sm:$0xff] }
  0x61   :  { %166 = vst.msk [vmem:[#allocation2] sm:$0xff] %vm165_vm0, %v157_v17  ;;  %v161_v28 = vpack.c.bf16 %v150_v19, %v149_v18  ;;  %v152_v29 = vsub.f32 %v120_v21, %v136_v24  ;;  %v130_v31 = vld [vmem:[#allocation9 + $0x28] sm:$0xff]  ;;  %v115_v32 = vld [vmem:[#allocation6 + $0x30] sm:$0xff]  ;;  %v145_v33 = vsub.f32 %v113_v26, %v129_v30  ;;  %v116_v35 = vld [vmem:[#allocation6 + $0x38] sm:$0xff] }
  0x62   :  { %167 = vst.msk [vmem:[#allocation2 + $0x8] sm:$0xff] %vm165_vm0, %v158_v23  ;;  %v146_v34 = vsub.f32 %v114_v27, %v130_v31  ;;  %v131_v36 = vld [vmem:[#allocation9 + $0x30] sm:$0xff]  ;;  %v132_v37 = vld [vmem:[#allocation9 + $0x38] sm:$0xff]  ;;  %v121_v41 = vld [vmem:[#allocation6 + $0x60] sm:$0xff] }
  0x63   :  { %170 = vst.msk [vmem:[#allocation2 + $0x20] sm:$0xff] %vm165_vm0, %v161_v28  ;;  %v162_v38 = vpack.c.bf16 %v152_v29, %v151_v25  ;;  %v147_v39 = vsub.f32 %v115_v32, %v131_v36  ;;  %v148_v40 = vsub.f32 %v116_v35, %v132_v37  ;;  %v122_v42 = vld [vmem:[#allocation6 + $0x68] sm:$0xff]  ;;  %v137_v43 = vld [vmem:[#allocation9 + $0x60] sm:$0xff]  ;;  %v123_v47 = vld [vmem:[#allocation6 + $0x70] sm:$0xff] }
  0x64   :  { %v159_v44 = vpack.c.bf16 %v146_v34, %v145_v33  ;;  %v138_v45 = vld [vmem:[#allocation9 + $0x68] sm:$0xff]  ;;  %v153_v46 = vsub.f32 %v121_v41, %v137_v43  ;;  %v124_v48 = vld [vmem:[#allocation6 + $0x78] sm:$0xff]  ;;  %v139_v51 = vld [vmem:[#allocation9 + $0x70] sm:$0xff] }
  0x65   :  { %171 = vst.msk [vmem:[#allocation2 + $0x28] sm:$0xff] %vm165_vm0, %v162_v38  ;;  %v160_v49 = vpack.c.bf16 %v148_v40, %v147_v39  ;;  %v154_v50 = vsub.f32 %v122_v42, %v138_v45  ;;  %v140_v52 = vld [vmem:[#allocation9 + $0x78] sm:$0xff]  ;;  %v155_v53 = vsub.f32 %v123_v47, %v139_v51 }
  0x66   :  { %168 = vst.msk [vmem:[#allocation2 + $0x10] sm:$0xff] %vm165_vm0, %v159_v44  ;;  %v156_v54 = vsub.f32 %v124_v48, %v140_v52 }
  0x67   :  { %169 = vst.msk [vmem:[#allocation2 + $0x18] sm:$0xff] %vm165_vm0, %v160_v49  ;;  %v163_v55 = vpack.c.bf16 %v154_v50, %v153_v46 }
  0x68   :  { %v174_v56 = vld [vmem:[#allocation2] sm:$0xff]  ;;  %v164_v57 = vpack.c.bf16 %v156_v54, %v155_v53 }
  0x69   :  { %705 = vmatprep.mubr.msk.bf16.mxu0 %vm165_vm0, %v174_v56  ;;  %v175_v58 = vld [vmem:[#allocation2 + $0x8] sm:$0xff]  ;;  %172 = vst.msk [vmem:[#allocation2 + $0x30] sm:$0xff] %vm165_vm0, %v163_v55 }
  0x6a   :  { %706 = vmatmul.mubr.msk.bf16.vlgmr.msra.gmra.mrb[0].mxu0 %vm165_vm0, %v175_v58  ;;  %v178_v59 = vld [vmem:[#allocation2 + $0x20] sm:$0xff]  ;;  %173 = vst.msk [vmem:[#allocation2 + $0x38] sm:$0xff] %vm165_vm0, %v164_v57 }
  0x6b   :  { %713 = vmatprep.mubr.msk.bf16.mxu1 %vm165_vm0, %v178_v59 }
  0x6c   :  { %v179_v60 = vld [vmem:[#allocation2 + $0x28] sm:$0xff] }
  0x6d   :  { %714 = vmatmul.mubr.msk.bf16.vlgmr.msra.gmra.mrb[0].mxu1 %vm165_vm0, %v179_v60  ;;  %v176_v61 = vld [vmem:[#allocation2 + $0x10] sm:$0xff] }
  0x6e   :  { %709 = vmatprep.mubr.msk.bf16.mxu0 %vm165_vm0, %v176_v61  ;;  %v177_v62 = vld [vmem:[#allocation2 + $0x18] sm:$0xff] }
  0x70   :  { %v180_v63 = vld [vmem:[#allocation2 + $0x30] sm:$0xff] }
  0x71   :  { %717 = vmatprep.mubr.msk.bf16.mxu1 %vm165_vm0, %v180_v63  ;;  %v181_v0 = vld [vmem:[#allocation2 + $0x38] sm:$0xff] }
  0x72   :  { %710 = vmatmul.mubr.msk.bf16.gmra.mrb[4].mxu0 %vm165_vm0, %v177_v62 }
  0x75   :  { %718 = vmatmul.mubr.msk.bf16.gmra.mrb[4].mxu1 %vm165_vm0, %v181_v0 }
 0x13d   :  { %v707_v2 = vpop.f32.mrb[0].mxu0 }
 0x13e   :  { %v248_v3 = vpop.f32.mrb[1].mxu0  ;;  %v330_v4 = vsub.f32 0.0, %v707_v2 }
 0x13f   :  { %v708_v5 = vpop.f32.mrb[2].mxu0  ;;  %v328_v6 = vsub.f32 0.0, %v248_v3 }
 0x140   :  { %v715_v7 = vpop.f32.mrb[0].mxu1  ;;  %v312_v8 = vpack.c.bf16 %v708_v5, %v707_v2  ;;  %v331_v9 = vsub.f32 0.0, %v708_v5  ;;  %v251_v10 = vpop.f32.mrb[3].mxu0  ;;  %v762_v11 = vpack.i.bf16 %v708_v5, %v707_v2 }
 0x141   :  { %v338_v12 = vsub.f32 0.0, %v715_v7  ;;  %v280_v13 = vpop.f32.mrb[1].mxu1  ;;  %v311_v14 = vpack.c.bf16 %v251_v10, %v248_v3  ;;  %v329_v15 = vsub.f32 0.0, %v251_v10  ;;  %v772_v16 = vpack.i.bf16 %v251_v10, %v248_v3 }
 0x142   :  { %321 = vst.msk [vmem:[#allocation3 + $0x8] sm:$0xff] %vm106_vm1, %v312_v8  ;;  %v336_v17 = vsub.f32 0.0, %v280_v13  ;;  %v716_v18 = vpop.f32.mrb[2].mxu1  ;;  %763 = vrot.lane.b32.xlu1 %v762_v11, %s1003_s4  ;;  %v782_v19 = vpack.i.bf16 %v331_v9, %v330_v4 }
 0x143   :  { %320 = vst.msk [vmem:[#allocation3] sm:$0xff] %vm106_vm1, %v311_v14  ;;  %v767_v20 = vpack.i.bf16 %v716_v18, %v715_v7  ;;  %v316_v21 = vpack.c.bf16 %v716_v18, %v715_v7  ;;  %v339_v22 = vsub.f32 0.0, %v716_v18  ;;  %v283_v23 = vpop.f32.mrb[3].mxu1  ;;  %773 = vrot.lane.b32.xlu0 %v772_v16, %s1003_s4  ;;  %v792_v24 = vpack.i.bf16 %v329_v15, %v328_v6 }
 0x144   :  { %v777_v25 = vpack.i.bf16 %v283_v23, %v280_v13  ;;  %v315_v26 = vpack.c.bf16 %v283_v23, %v280_v13  ;;  %v337_v27 = vsub.f32 0.0, %v283_v23 }
 0x145   :  { %325 = vst.msk [vmem:[#allocation3 + $0x28] sm:$0xff] %vm106_vm1, %v316_v21  ;;  %v711_v28 = vpop.f32.mrb[4].mxu0  ;;  %v787_v29 = vpack.i.bf16 %v339_v22, %v338_v12 }
 0x146   :  { %324 = vst.msk [vmem:[#allocation3 + $0x20] sm:$0xff] %vm106_vm1, %v315_v26  ;;  %768 = vrot.lane.b32.xlu1 %v767_v20, %s1003_s4  ;;  %v334_v30 = vsub.f32 0.0, %v711_v28  ;;  %v264_v31 = vpop.f32.mrb[5].mxu0  ;;  %v797_v32 = vpack.i.bf16 %v337_v27, %v336_v17 }
 0x147   :  { %778 = vrot.lane.b32.xlu0 %v777_v25, %s1003_s4  ;;  %v332_v33 = vsub.f32 0.0, %v264_v31  ;;  %v712_v34 = vpop.f32.mrb[6].mxu0 }
 0x148   :  { %v802_v35 = vpack.i.bf16 %v712_v34, %v711_v28  ;;  %v314_v36 = vpack.c.bf16 %v712_v34, %v711_v28  ;;  %v335_v37 = vsub.f32 0.0, %v712_v34  ;;  %v267_v38 = vpop.f32.mrb[7].mxu0  ;;  %v719_v39 = vpop.f32.mrb[4].mxu1 }
 0x149   :  { %v807_v40 = vpack.i.bf16 %v267_v38, %v264_v31  ;;  %v333_v41 = vsub.f32 0.0, %v267_v38  ;;  %v313_v42 = vpack.c.bf16 %v267_v38, %v264_v31  ;;  %v342_v43 = vsub.f32 0.0, %v719_v39  ;;  %v296_v44 = vpop.f32.mrb[5].mxu1 }
 0x14a   :  { %323 = vst.msk [vmem:[#allocation3 + $0x18] sm:$0xff] %vm106_vm1, %v314_v36  ;;  %788 = vrot.lane.b32.xlu1 %v787_v29, %s1004_s18  ;;  %v340_v45 = vsub.f32 0.0, %v296_v44  ;;  %v720_v46 = vpop.f32.mrb[6].mxu1  ;;  %v812_v47 = vpack.i.bf16 %v335_v37, %v334_v30 }
 0x14b   :  { %v822_v48 = vpack.i.bf16 %v333_v41, %v332_v33  ;;  %322 = vst.msk [vmem:[#allocation3 + $0x10] sm:$0xff] %vm106_vm1, %v313_v42  ;;  %783 = vrot.lane.b32.xlu0 %v782_v19, %s1004_s18  ;;  %v837_v49 = vpack.i.bf16 %v720_v46, %v719_v39  ;;  %v318_v50 = vpack.c.bf16 %v720_v46, %v719_v39  ;;  %v343_v51 = vsub.f32 0.0, %v720_v46  ;;  %v299_v52 = vpop.f32.mrb[7].mxu1 }
 0x14c   :  { %v832_v53 = vpack.i.bf16 %v299_v52, %v296_v44  ;;  %v341_v54 = vsub.f32 0.0, %v299_v52  ;;  %v317_v55 = vpack.c.bf16 %v299_v52, %v296_v44 }
 0x14d   :  { %327 = vst.msk [vmem:[#allocation3 + $0x38] sm:$0xff] %vm106_vm1, %v318_v50  ;;  %v817_v56 = vpack.i.bf16 %v343_v51, %v342_v43 }
 0x14e   :  { %803 = vrot.lane.b32.xlu1 %v802_v35, %s1003_s4  ;;  %v827_v57 = vpack.i.bf16 %v341_v54, %v340_v45  ;;  %326 = vst.msk [vmem:[#allocation3 + $0x30] sm:$0xff] %vm106_vm1, %v317_v55 }
 0x14f   :  { %793 = vrot.lane.b32.xlu0 %v792_v24, %s1004_s18 }
 0x152   :  { %813 = vrot.lane.b32.xlu1 %v812_v47, %s1004_s18 }
 0x153   :  { %798 = vrot.lane.b32.xlu0 %v797_v32, %s1004_s18 }
 0x156   :  { %818 = vrot.lane.b32.xlu1 %v817_v56, %s1004_s18 }
 0x157   :  { %808 = vrot.lane.b32.xlu0 %v807_v40, %s1003_s4 }
 0x15a   :  { %823 = vrot.lane.b32.xlu1 %v822_v48, %s1004_s18 }
 0x15b   :  { %828 = vrot.lane.b32.xlu0 %v827_v57, %s1004_s18 }
 0x15e   :  { %838 = vrot.lane.b32.xlu1 %v837_v49, %s1003_s4 }
 0x15f   :  { %833 = vrot.lane.b32.xlu0 %v832_v53, %s1003_s4 }
 0x1b4   :  { %v764_v58 = vpop.permute.xlu1 %763 }
 0x1b5   :  { %v774_v59 = vpop.permute.xlu0 %773  ;;  %v766_v4 = vunpack.i.h.bf16 %v764_v58  ;;  %v765_v5 = vunpack.i.l.bf16 %v764_v58 }
 0x1b6   :  { %v776_v16 = vunpack.i.h.bf16 %v774_v59  ;;  %v775_v17 = vunpack.i.l.bf16 %v774_v59 }
 0x1b8   :  { %v769_v60 = vpop.permute.xlu1 %768 }
 0x1b9   :  { %v779_v61 = vpop.permute.xlu0 %778  ;;  %v771_v63 = vunpack.i.h.bf16 %v769_v60  ;;  %v770_v0 = vunpack.i.l.bf16 %v769_v60 }
 0x1ba   :  { %v781_v29 = vunpack.i.h.bf16 %v779_v61  ;;  %v780_v30 = vunpack.i.l.bf16 %v779_v61 }
 0x1bc   :  { %v789_v62 = vpop.permute.xlu1 %788 }
 0x1bd   :  { %v791_v1 = vunpack.i.h.bf16 %v789_v62  ;;  %v790_v2 = vunpack.i.l.bf16 %v789_v62  ;;  %v784_v3 = vpop.permute.xlu0 %783 }
 0x1be   :  { %v786_v6 = vunpack.i.h.bf16 %v784_v3  ;;  %v785_v7 = vunpack.i.l.bf16 %v784_v3 }
 0x1bf   :  { %v482_v8 = vsel %vm165_vm0, %v790_v2, %v770_v0  ;;  %v483_v9 = vsel %vm165_vm0, %v791_v1, %v771_v63 }
 0x1c0   :  { %v493_v10 = vpack.c.bf16 %v483_v9, %v482_v8  ;;  %v475_v11 = vsel %vm165_vm0, %v786_v6, %v766_v4  ;;  %v474_v12 = vsel %vm165_vm0, %v785_v7, %v765_v5  ;;  %v804_v13 = vpop.permute.xlu1 %803 }
 0x1c1   :  { %v489_v14 = vpack.c.bf16 %v475_v11, %v474_v12  ;;  %v794_v15 = vpop.permute.xlu0 %793  ;;  %v806_v20 = vunpack.i.h.bf16 %v804_v13  ;;  %v805_v24 = vunpack.i.l.bf16 %v804_v13 }
 0x1c2   :  { %501 = vst.msk [vmem:[#allocation4 + $0x28] sm:$0xff] %vm106_vm1, %v493_v10  ;;  %v796_v18 = vunpack.i.h.bf16 %v794_v15  ;;  %v795_v19 = vunpack.i.l.bf16 %v794_v15 }
 0x1c3   :  { %497 = vst.msk [vmem:[#allocation4 + $0x8] sm:$0xff] %vm106_vm1, %v489_v14 }
 0x1c4   :  { %v473_v21 = vsel %vm165_vm0, %v796_v18, %v776_v16  ;;  %v472_v22 = vsel %vm165_vm0, %v795_v19, %v775_v17  ;;  %v814_v23 = vpop.permute.xlu1 %813 }
 0x1c5   :  { %v488_v25 = vpack.c.bf16 %v473_v21, %v472_v22  ;;  %v816_v26 = vunpack.i.h.bf16 %v814_v23  ;;  %v815_v27 = vunpack.i.l.bf16 %v814_v23  ;;  %v799_v28 = vpop.permute.xlu0 %798 }
 0x1c6   :  { %v801_v31 = vunpack.i.h.bf16 %v799_v28  ;;  %v800_v32 = vunpack.i.l.bf16 %v799_v28 }
 0x1c7   :  { %496 = vst.msk [vmem:[#allocation4] sm:$0xff] %vm106_vm1, %v488_v25  ;;  %v479_v33 = vsel %vm165_vm0, %v816_v26, %v806_v20  ;;  %v478_v34 = vsel %vm165_vm0, %v815_v27, %v805_v24 }
 0x1c8   :  { %v491_v35 = vpack.c.bf16 %v479_v33, %v478_v34  ;;  %v481_v36 = vsel %vm165_vm0, %v801_v31, %v781_v29  ;;  %v480_v37 = vsel %vm165_vm0, %v800_v32, %v780_v30  ;;  %v819_v38 = vpop.permute.xlu1 %818 }
 0x1c9   :  { %v492_v39 = vpack.c.bf16 %v481_v36, %v480_v37  ;;  %v809_v40 = vpop.permute.xlu0 %808  ;;  %v821_v51 = vunpack.i.h.bf16 %v819_v38  ;;  %v820_v52 = vunpack.i.l.bf16 %v819_v38 }
 0x1ca   :  { %499 = vst.msk [vmem:[#allocation4 + $0x18] sm:$0xff] %vm106_vm1, %v491_v35  ;;  %v811_v42 = vunpack.i.h.bf16 %v809_v40  ;;  %v810_v43 = vunpack.i.l.bf16 %v809_v40 }
 0x1cb   :  { %500 = vst.msk [vmem:[#allocation4 + $0x20] sm:$0xff] %vm106_vm1, %v492_v39 }
 0x1cc   :  { %v824_v41 = vpop.permute.xlu1 %823 }
 0x1cd   :  { %v826_v44 = vunpack.i.h.bf16 %v824_v41  ;;  %v825_v45 = vunpack.i.l.bf16 %v824_v41  ;;  %v829_v46 = vpop.permute.xlu0 %828 }
 0x1ce   :  { %v831_v56 = vunpack.i.h.bf16 %v829_v46  ;;  %v830_v57 = vunpack.i.l.bf16 %v829_v46 }
 0x1cf   :  { %v477_v47 = vsel %vm165_vm0, %v826_v44, %v811_v42  ;;  %v476_v48 = vsel %vm165_vm0, %v825_v45, %v810_v43 }
 0x1d0   :  { %v490_v49 = vpack.c.bf16 %v477_v47, %v476_v48  ;;  %v839_v50 = vpop.permute.xlu1 %838 }
 0x1d1   :  { %v841_v53 = vunpack.i.h.bf16 %v839_v50  ;;  %v840_v54 = vunpack.i.l.bf16 %v839_v50  ;;  %v834_v55 = vpop.permute.xlu0 %833 }
 0x1d2   :  { %498 = vst.msk [vmem:[#allocation4 + $0x10] sm:$0xff] %vm106_vm1, %v490_v49  ;;  %v836_v58 = vunpack.i.h.bf16 %v834_v55  ;;  %v835_v59 = vunpack.i.l.bf16 %v834_v55 }
 0x1d3   :  { %v487_v60 = vsel %vm165_vm0, %v821_v51, %v841_v53  ;;  %v486_v61 = vsel %vm165_vm0, %v820_v52, %v840_v54 }
 0x1d4   :  { %v495_v62 = vpack.c.bf16 %v487_v60, %v486_v61  ;;  %v484_v63 = vsel %vm165_vm0, %v830_v57, %v835_v59  ;;  %v485_v0 = vsel %vm165_vm0, %v831_v56, %v836_v58 }
 0x1d5   :  { %v494_v1 = vpack.c.bf16 %v485_v0, %v484_v63 }
 0x1d6   :  { %503 = vst.msk [vmem:[#allocation4 + $0x38] sm:$0xff] %vm106_vm1, %v495_v62 }
 0x1d7   :  { %502 = vst.msk [vmem:[#allocation4 + $0x30] sm:$0xff] %vm106_vm1, %v494_v1 }
 0x1d8 LB: > { %v1005_v2 = vmov 0.0   ;;  %s683_s6 = sshll.u32 %s991_s19, 4  ;;  %vm1006_vm2 = vmmov 0   ;;  %v843_v3 = vld [vmem:[#allocation14] sm:$0xff]   ;;  %v844_v6 = vld [vmem:[#allocation12] sm:$0xff]   ;;  %v622_v19 = vld [vmem:[#allocation5 + $0x8] sm:$0xff]  ;;  %s991_s19 = sphi %s1171_s19, %s509_s19  }
 0x1d9   : > { %721 = vmatprep.subr.bf16.mxu1 %v1005_v2  ;;  %727 = vmatprep.subr.bf16.mxu0 %v1005_v2  ;;  %s511_s3 = sshra.s32 %s683_s6, 4  ;;  %v621_v12 = vld [vmem:[#allocation5] sm:$0xff]  ;;  %s509_s19 = sadd.s32 1, %s991_s19  }
 0x1da   : > { %723 = vmatprep.mubr.msk.bf16.mxu1 %vm1006_vm2, %v1005_v2  ;;  %729 = vmatprep.mubr.msk.bf16.mxu0 %vm1006_vm2, %v1005_v2  ;;  %s684_s7 = sshll.u32 %s511_s3, 3  ;;  %p506_p12 = scmp.ge.s32.totalorder %s509_s19, 8  }
 0x1db   : > { %s517_s8 = scalar_lea.vmem [#allocation4], %s684_s7  ;;  %s514_s9 = scalar_lea.vmem [#allocation3], %s684_s7 }
 0x1dc   : > { %v515_v5 = vld [vmem:[%s514_s9] sm:$0xff]  ;;  %s1007_s11 = smov (%p506_p12), [#allocation15]  }
 0x1dd   : > { %728 = vmatpush3.bf16.msra.mxu0 %v515_v5  ;;  %s654_s12 = sshll.u32 (%p506_p12), %s1007_s11, 4  ;;  %s655_s12 = int_to_ptr.vmem [resolvable:$true] %s654_s12 }
 0x1de   : > { %v518_v4 = vld [vmem:[%s517_s8] sm:$0xff]  ;;  %s955_s14 = scalar_lea.vmem (%p506_p12), %s655_s12, 128  ;;  %p960_p0 = scmp.lt.s32.totalorder (%p506_p12), %s655_s12, %s655_s12 }
 0x1df   : > { %722 = vmatpush3.bf16.msra.mxu1 %v518_v4  ;;  %p956_p13 = scmp.ne.s32.totalorder (%p506_p12), %s655_s12, %s955_s14  ;;  %p961_p1 = scmp.lt.s32.totalorder (%p506_p12), %s955_s14, %s955_s14 }
 0x1e0   : > { %730 = vmatmul.mubr.msk.bf16.vlgmr.msra.gmra.mrb[0].mxu0 %vm165_vm0, %v844_v6 }
 0x1e1   :  { %p962_p2 = por (%p506_p12), %p961_p1, %p960_p0 }
 0x1e2   : > { %724 = vmatmul.mubr.msk.bf16.vlgmr.msra.gmra.mrb[0].mxu1 %vm165_vm0, %v843_v3 }
 0x1e3   :  { %p963_p3 = pnand (%p506_p12), %p962_p2, %p956_p13 }
 0x2b3   : > { %v614_v8 = vpop.f32.mrb[0].mxu0 }
 0x2b4   : > { %v731_v11 = vpop.f32.mrb[1].mxu0 }
 0x2b5   : > { %v565_v7 = vpop.f32.mrb[0].mxu1  ;;  %v617_v14 = vpop.f32.mrb[2].mxu0 }
 0x2b6   : > { %v615_v9 = vadd.f32 %v614_v8, %v565_v7  ;;  %v725_v10 = vpop.f32.mrb[1].mxu1  ;;  %v732_v18 = vpop.f32.mrb[3].mxu0 }
 0x2b7   : > { %v568_v13 = vpop.f32.mrb[2].mxu1 }
 0x2b8   : > { %v623_v15 = vand.u32 2147483647, %v615_v9  ;;  %v618_v16 = vadd.f32 %v617_v14, %v568_v13  ;;  %v726_v17 = vpop.f32.mrb[3].mxu1  ;;  %508 = sbr.rel (!%p506_p12) target bundleno = 472 (0x1d8), region = 79 }
 0x2ba   : > { %v625_v20 = vadd.f32 %v623_v15, %v621_v12  ;;  %v624_v21 = vand.u32 2147483647, %v618_v16 }
 0x2bc   : > { %627 = vst.msk [vmem:[#allocation5] sm:$0xff] %vm106_vm1, %v625_v20  ;;  %v626_v22 = vadd.f32 %v624_v21, %v622_v19 }
 0x2be   : > { %628 = vst.msk [vmem:[#allocation5 + $0x8] sm:$0xff] %vm106_vm1, %v626_v22 }
 0x2c3   :  { %v632_v23 = vld [vmem:[#allocation5] sm:$0xff] }
 0x2c4   :  { %v634_v25 = vsel %vm106_vm1, %v632_v23, 0.0 }
 0x2c5   :  { %v633_v24 = vld [vmem:[#allocation5 + $0x8] sm:$0xff] }
 0x2c6   :  { %v635_v26 = vsel %vm106_vm1, %v633_v24, 0.0 }
 0x2c7   :  { %v636_v27 = vadd.f32 %v635_v26, %v634_v25 }
 0x2c9   :  { %637 = vadd.xlane.f32.xlu0 %v636_v27 }
 0x356   :  { %v638_v28 = vpop.xlane.xlu0 %637 }
 0x357   :  { %v639_v29 = vrot.slane %v638_v28, 4 }
 0x359   :  { %v640_v30 = vadd.f32 %v639_v29, %v638_v28 }
 0x35b   :  { %v641_v31 = vrot.slane %v640_v30, 2 }
 0x35d   :  { %v642_v32 = vadd.f32 %v641_v31, %v640_v30 }
 0x35f   :  { %v643_v33 = vrot.slane %v642_v32, 1 }
 0x361   :  { %v644_v34 = vadd.f32 %v643_v33, %v642_v32 }
 0x363   :  { %737 = vpush %v644_v34 }
 0x394   :  { %s738_s13 = spop %737 }
 0x395   :  { %v646_v35 = vstv %s738_s13 }
 0x396   :  { %647 = vst [vmem:[#allocation15] sm:$0xff] %v646_v35 }
 0x397   :  { %966 = shalt.err (!%p963_p3)
}
 0x398   :  { %s967_s17 = scalar_lea.hbm %s1203_s5, 128 }
 0x399   :  { %p968_p4 = scmp.ne.s32.totalorder %s1203_s5, %s967_s17  ;;  %p971_p5 = scmp.lt.u32.totalorder %s967_s17, %s1203_s5 }
 0x39b   :  { %p973_p6 = pnand %p971_p5, %p968_p4 }
 0x39d   :  { %976 = shalt.err (!%p973_p6)
}
 0x39e   :  { %657 = dma.vmem_to_hbm [thread:$0]  %s655_s12, 128, %s1203_s5, [#allocation8]  }
 0x39f   :  { %987 = dma.done.wait [#allocation8], 128  }
 0x3a0   :  { %988 = vsyncadd [#allocation8], 4294967168 }
 0x3a1   :  { %661 = vsyncpa [#allocation7], 1 }
 0x3a2   :  { %662 = vsyncpa [#allocation10], 1 }
 0x3a3   :  { %663 = vsyncpa [#allocation13], 1 }
 0x3a4   :  { %664 = vsyncpa [#allocation8], 1 }

</bundles_post_ra>
